<compile_context>
chip_gen: v6e
topology: v6e:2x2x1
jax: 0.10.0
libtpu: 0.0.40
codegen_flags: <defaults>
</compile_context>

<pallas_src>
import numpy as np
import jax
import jax.numpy as jnp
from jax import lax
from jax.experimental import pallas as pl
from jax.experimental.pallas import tpu as pltpu


# ----------------------------------------------------------------------------------
# Pallas kernel: post-encoder compute of SAP.forward for the WHOLE batch.
# ----------------------------------------------------------------------------------
def sap_kernel(l_n_ref,       # [bS, 1]        int32  valid question length per example
               wenc_n_ref,    # [bS, mL_n, hS] bf16   encoded question tokens
               hs_ob_ref,     # [bS, hS]       f32    encoding of the predicted select col
               watt_wT_ref,   # [hS, hS]       f32    W_att, pre-transposed for plain dot
               watt_b_ref,    # [1, hS]        f32
               w1_ref,        # [hS, hS]       f32    sa_out[0] weight (as [in, out])
               b1_ref,        # [1, hS]        f32
               w2_ref,        # [hS, nP]       f32    sa_out[2] weight, lane-padded to 128
               b2_ref,        # [1, nP]        f32
               s_ref):        # [bS, nP]       f32    output scores (lane-padded)
    f32 = jnp.float32
    # bf16 only for the HBM->VMEM transfer; upcast right after load so the
    # VPU/EUP elementwise path stays f32 on all generations (incl. v5e).
    wenc_n = wenc_n_ref[...].astype(f32)
    bS, mL_n, hS = wenc_n.shape
    hs_ob = hs_ob_ref[...]

    # att[b, j] = <W_att(wenc_n[b, j]), hs_ob[b]>
    #           = <wenc_n[b, j], hs_ob[b] @ W_att^T> + <b_att, hs_ob[b]>
    # -> apply W_att to the bS key vectors, not the bS*mL_n token rows.
    u = jnp.dot(hs_ob, watt_wT_ref[...], preferred_element_type=f32)      # [bS, hS]
    beta = jnp.sum(hs_ob * watt_b_ref[...], axis=-1, keepdims=True)       # [bS, 1]
    att = jnp.sum(wenc_n * u[:, None, :], axis=-1) + beta                 # [bS, mL_n]

    # mask padded question tokens, softmax over the token axis (torch dim=1)
    col = lax.broadcasted_iota(jnp.int32, (bS, mL_n), 1)
    att = jnp.where(col < l_n_ref[...], att, jnp.float32(-1e10))
    att_max = jnp.max(att, axis=-1, keepdims=True)
    e = jnp.exp(att - att_max)
    p = e * pl.reciprocal(jnp.sum(e, axis=-1, keepdims=True), approx=True)

    # context vector c_n[b] = sum_j p[b, j] * wenc_n[b, j]
    # VPU multiply + sublane reduce (cheaper than bS M=1 matmuls on the MXU).
    c_n = jnp.sum(p[:, :, None] * wenc_n, axis=1)                         # [bS, hS]

    # sa_out: Linear(hS, hS) -> tanh -> Linear(hS, n_agg_ops)  (lane-padded output)
    h = jnp.tanh(jnp.dot(c_n, w1_ref[...], preferred_element_type=f32) + b1_ref[...])
    s_ref[...] = jnp.dot(h, w2_ref[...], preferred_element_type=f32) + b2_ref[...]


def prepare_sap_kernel_params(params):
    """One-time parameter prep: transpose W_att, lane-pad the final linear."""
    watt_w, watt_b, w1, b1, w2, b2 = params
    hS, n_agg_ops = w2.shape
    n_pad = max(128, ((n_agg_ops + 127) // 128) * 128)
    w2_pad = jnp.zeros((hS, n_pad), jnp.float32).at[:, :n_agg_ops].set(w2)
    b2_pad = jnp.zeros((1, n_pad), jnp.float32).at[:, :n_agg_ops].set(b2)
    # u = hs_ob @ watt_w.T  (watt_w stored [in, out]); transpose once here so the
    # kernel's matmul has a plain, non-transposed RHS.
    kparams = (jnp.asarray(watt_w).T, watt_b, w1, b1, w2_pad, b2_pad)
    return kparams, n_agg_ops


def sap_post_pallas(wenc_n, wenc_hs_ob, l_n_arr, kparams, n_agg_ops):
    """Post-encoder SAP forward (attention + softmax + context + sa_out MLP)."""
    bS, mL_n, hS = wenc_n.shape
    watt_wT, watt_b, w1, b1, w2_pad, b2_pad = kparams
    n_pad = w2_pad.shape[1]

    l_n_2d = l_n_arr.astype(jnp.int32).reshape(bS, 1)
    wenc_n_bf16 = wenc_n.astype(jnp.bfloat16)   # halve the dominant DMA bytes

    vmem = pl.BlockSpec(memory_space=pltpu.MemorySpace.VMEM)
    # Whole batch in a single invocation: at these sizes everything fits VMEM with
    # huge headroom; no grid and no per-step overhead.  For large bS, chunk the
    # batch with a 1-D grid marked "parallel" (see TODO at top of file).
    s_pad = pl.pallas_call(
        sap_kernel,
        out_shape=jax.ShapeDtypeStruct((bS, n_pad), jnp.float32),
        in_specs=[vmem] * 9,
        out_specs=vmem,
    )(l_n_2d, wenc_n_bf16, wenc_hs_ob, watt_wT, watt_b, w1, b1, w2_pad, b2_pad)
    return s_pad[:, :n_agg_ops]


# ----------------------------------------------------------------------------------
# Plain-JAX glue: bidirectional 2-layer LSTM encoders (packed-sequence semantics).
# ----------------------------------------------------------------------------------
def _lstm_cell(x, h, c, Wih, Whh, bih, bhh):
    gates = x @ Wih.T + h @ Whh.T + bih + bhh
    i, f, g, o = jnp.split(gates, 4, axis=-1)
    i = jax.nn.sigmoid(i); f = jax.nn.sigmoid(f)
    g = jnp.tanh(g); o = jax.nn.sigmoid(o)
    c_new = f * c + i * g
    h_new = o * jnp.tanh(c_new)
    return h_new, c_new


def _run_lstm_dir(x, lengths, params):
    B, T, _ = x.shape
    Wih, Whh, bih, bhh = params
    H = Whh.shape[1]
    mask = jnp.arange(T)[None, :] < lengths[:, None]

    def step(carry, inp):
        h, c = carry
        xt, mt = inp
        h_new, c_new = _lstm_cell(xt, h, c, Wih, Whh, bih, bhh)
        mt = mt[:, None]
        h = jnp.where(mt, h_new, h)
        c = jnp.where(mt, c_new, c)
        out = jnp.where(mt, h_new, 0.0)
        return (h, c), out

    init = (jnp.zeros((B, H), jnp.float32), jnp.zeros((B, H), jnp.float32))
    xs = (jnp.swapaxes(x, 0, 1), jnp.swapaxes(mask, 0, 1))
    _, outs = lax.scan(step, init, xs)
    return jnp.swapaxes(outs, 0, 1)


def _reverse_within_length(x, lengths):
    T = x.shape[1]
    idx = jnp.clip(lengths[:, None] - 1 - jnp.arange(T)[None, :], 0, T - 1)
    return jnp.take_along_axis(x, idx[..., None], axis=1)


def bilstm_encode(x, lengths, layer_params):
    h = x
    T = x.shape[1]
    mask = (jnp.arange(T)[None, :] < lengths[:, None])[..., None]
    for pf, pb in layer_params:
        out_f = _run_lstm_dir(h, lengths, pf)
        h_rev = _reverse_within_length(h, lengths)
        out_b = _reverse_within_length(_run_lstm_dir(h_rev, lengths, pb), lengths)
        out_b = jnp.where(mask, out_b, 0.0)
        h = jnp.concatenate([out_f, out_b], axis=-1)
    return h  # [B, T, hS], zero at padded positions (packed-sequence semantics)


def init_lstm(key, input_size, hidden_half, num_layers):
    layers = []
    for layer in range(num_layers):
        in_size = input_size if layer == 0 else 2 * hidden_half
        dirs = []
        for _ in range(2):
            key, k1, k2, k3, k4 = jax.random.split(key, 5)
            Wih = 0.1 * jax.random.normal(k1, (4 * hidden_half, in_size), jnp.float32)
            Whh = 0.1 * jax.random.normal(k2, (4 * hidden_half, hidden_half), jnp.float32)
            bih = 0.1 * jax.random.normal(k3, (4 * hidden_half,), jnp.float32)
            bhh = 0.1 * jax.random.normal(k4, (4 * hidden_half,), jnp.float32)
            dirs.append((Wih, Whh, bih, bhh))
        layers.append(tuple(dirs))
    return layers, key


def init_linear_T(key, in_dim, out_dim):
    key, k1, k2 = jax.random.split(key, 3)
    w = 0.1 * jax.random.normal(k1, (in_dim, out_dim), jnp.float32)  # stored as W^T
    b = 0.1 * jax.random.normal(k2, (1, out_dim), jnp.float32)
    return (w, b), key


# pure-JAX reference of the post-encoder math (correctness check only)
def reference_post(wenc_n, wenc_hs_ob, l_n_arr, params):
    watt_w, watt_b, w1, b1, w2, b2 = params
    mL_n = wenc_n.shape[1]
    x_att = wenc_n @ watt_w + watt_b                       # [bS, mL_n, hS]
    att = jnp.einsum('bjh,bh->bj', x_att, wenc_hs_ob)      # [bS, mL_n]
    mask = jnp.arange(mL_n)[None, :] < l_n_arr[:, None]
    att = jnp.where(mask, att, -1e10)
    p = jax.nn.softmax(att, axis=1)
    c_n = jnp.einsum('bj,bjh->bh', p, wenc_n)
    h = jnp.tanh(c_n @ w1 + b1)
    return h @ w2 + b2


if __name__ == "__main__":
    # module hyper-params (small shapes consistent with the module)
    iS, hS, lS, n_agg_ops = 16, 32, 2, 6
    bS = 2
    l_n = [8, 5]
    mL_n = max(l_n)
    l_hs = [3, 4]                       # headers per example
    l_hpu = [2, 3, 4, 1, 2, 3, 4]       # token length per header (sum(l_hs) headers)
    mL_hpu = max(l_hpu)
    pr_sc = [1, 2]                      # predicted select column per example

    key = jax.random.PRNGKey(0)
    key, kn, kh = jax.random.split(key, 3)
    wemb_n = jax.random.normal(kn, (bS, mL_n, iS), jnp.float32)
    wemb_hpu = jax.random.normal(kh, (len(l_hpu), mL_hpu, iS), jnp.float32)

    # ---- parameters ----
    enc_n_params, key = init_lstm(key, iS, hS // 2, lS)
    enc_h_params, key = init_lstm(key, iS, hS // 2, lS)
    (watt_w, watt_b), key = init_linear_T(key, hS, hS)       # W_att
    (w1, b1), key = init_linear_T(key, hS, hS)               # sa_out[0]
    (w2, b2), key = init_linear_T(key, hS, n_agg_ops)        # sa_out[2]
    params = (watt_w, watt_b, w1, b1, w2, b2)
    kparams, n_agg = prepare_sap_kernel_params(params)       # one-time prep

    # ---- encoders (plain JAX glue) ----
    l_n_arr = jnp.asarray(l_n, jnp.int32)
    wenc_n = bilstm_encode(wemb_n, l_n_arr, enc_n_params)               # [bS, mL_n, hS]

    hpu_out = bilstm_encode(wemb_hpu, jnp.asarray(l_hpu, jnp.int32), enc_h_params)
    hpu_last = hpu_out[jnp.arange(len(l_hpu)), jnp.asarray(l_hpu) - 1]  # [N_hdr, hS]

    # group per-header encodings into [bS, max(l_hs), hS] and pick the pr_sc column
    hpu_last_np = np.asarray(hpu_last)
    wenc_hs_np = np.zeros((bS, max(l_hs), hS), np.float32)
    st = 0
    for b, l in enumerate(l_hs):
        wenc_hs_np[b, :l] = hpu_last_np[st:st + l]
        st += l
    wenc_hs_ob = jnp.asarray(wenc_hs_np[np.arange(bS), pr_sc])          # [bS, hS]

    # ---- Pallas kernel ----
    s_sa = sap_post_pallas(wenc_n, wenc_hs_ob, l_n_arr, kparams, n_agg)
    s_sa = jax.block_until_ready(s_sa)
    assert s_sa.shape == (bS, n_agg_ops)

    # correctness check: reference gets the same bf16-quantized wenc_n the kernel
    # sees (the bf16 transfer is the only intended numerics change vs f32).
    wenc_n_q = wenc_n.astype(jnp.bfloat16).astype(jnp.float32)
    s_ref = reference_post(wenc_n_q, wenc_hs_ob, l_n_arr, params)
    assert np.allclose(np.asarray(s_sa), np.asarray(s_ref), rtol=2e-3, atol=2e-3)

    print("KERNEL_OK")
</pallas_src>

<mosaic_0001>
module attributes {stable_mosaic.version = 11 : i64} {
  func.func @sap_kernel(%arg0: memref<2x1xi32, #tpu.memory_space<vmem>>, %arg1: memref<2x8x32xbf16, #tpu.memory_space<vmem>>, %arg2: memref<2x32xf32, #tpu.memory_space<vmem>>, %arg3: memref<32x32xf32, #tpu.memory_space<vmem>>, %arg4: memref<1x32xf32, #tpu.memory_space<vmem>>, %arg5: memref<32x32xf32, #tpu.memory_space<vmem>>, %arg6: memref<1x32xf32, #tpu.memory_space<vmem>>, %arg7: memref<32x128xf32, #tpu.memory_space<vmem>>, %arg8: memref<1x128xf32, #tpu.memory_space<vmem>>, %arg9: memref<2x128xf32, #tpu.memory_space<vmem>>) attributes {dimension_semantics = [], scalar_prefetch = 0 : i64, scratch_operands = 0 : i64, tpu.core_type = #tpu.core_type<tc>} {
    %c0 = arith.constant 0 : index
    %c0_0 = arith.constant 0 : index
    %c0_1 = arith.constant 0 : index
    %0 = vector.load %arg1[%c0, %c0_0, %c0_1] : memref<2x8x32xbf16, #tpu.memory_space<vmem>>, vector<2x8x32xbf16>
    %1 = arith.extf %0 : vector<2x8x32xbf16> to vector<2x8x32xf32>
    %c0_2 = arith.constant 0 : index
    %c0_3 = arith.constant 0 : index
    %2 = vector.load %arg2[%c0_2, %c0_3] : memref<2x32xf32, #tpu.memory_space<vmem>>, vector<2x32xf32>
    %c0_4 = arith.constant 0 : index
    %c0_5 = arith.constant 0 : index
    %3 = vector.load %arg3[%c0_4, %c0_5] : memref<32x32xf32, #tpu.memory_space<vmem>>, vector<32x32xf32>
    %cst = arith.constant dense<0.000000e+00> : vector<2x32xf32>
    %4 = tpu.matmul %2, %3, %cst {dimension_numbers = #tpu.dot_dimension_numbers<[1], [0], [0], [1], [0, 0, 1, 1], [], []>} : vector<2x32xf32>, vector<32x32xf32>, vector<2x32xf32> -> vector<2x32xf32>
    %c0_6 = arith.constant 0 : index
    %c0_7 = arith.constant 0 : index
    %5 = vector.load %arg4[%c0_6, %c0_7] : memref<1x32xf32, #tpu.memory_space<vmem>>, vector<1x32xf32>
    %6 = vector.broadcast %5 : vector<1x32xf32> to vector<2x32xf32>
    %7 = arith.mulf %2, %6 : vector<2x32xf32>
    %cst_8 = arith.constant dense<0.000000e+00> : vector<2xf32>
    %8 = vector.multi_reduction <add>, %7, %cst_8 [1] : vector<2x32xf32> to vector<2xf32>
    %9 = vector.shape_cast %8 : vector<2xf32> to vector<2x1xf32>
    %10 = vector.shape_cast %4 : vector<2x32xf32> to vector<2x1x32xf32>
    %11 = vector.broadcast %10 : vector<2x1x32xf32> to vector<2x8x32xf32>
    %12 = arith.mulf %1, %11 : vector<2x8x32xf32>
    %cst_9 = arith.constant dense<0.000000e+00> : vector<2x8xf32>
    %13 = vector.multi_reduction <add>, %12, %cst_9 [2] : vector<2x8x32xf32> to vector<2x8xf32>
    %14 = vector.broadcast %9 : vector<2x1xf32> to vector<2x8xf32>
    %15 = arith.addf %13, %14 : vector<2x8xf32>
    %16 = tpu.iota {dimensions = array<i32: 1>} : vector<2x8xi32>
    %c0_10 = arith.constant 0 : index
    %c0_11 = arith.constant 0 : index
    %17 = vector.load %arg0[%c0_10, %c0_11] : memref<2x1xi32, #tpu.memory_space<vmem>>, vector<2x1xi32>
    %18 = vector.broadcast %17 : vector<2x1xi32> to vector<2x8xi32>
    %19 = arith.cmpi slt, %16, %18 : vector<2x8xi32>
    %cst_12 = arith.constant -1.000000e+10 : f32
    %20 = vector.broadcast %cst_12 : f32 to vector<2x8xf32>
    %21 = arith.select %19, %15, %20 : vector<2x8xi1>, vector<2x8xf32>
    %cst_13 = arith.constant dense<0xFF800000> : vector<2xf32>
    %22 = vector.multi_reduction <maximumf>, %21, %cst_13 [1] : vector<2x8xf32> to vector<2xf32>
    %23 = vector.shape_cast %22 : vector<2xf32> to vector<2x1xf32>
    %24 = vector.broadcast %23 : vector<2x1xf32> to vector<2x8xf32>
    %25 = arith.subf %21, %24 : vector<2x8xf32>
    %26 = math.exp %25 : vector<2x8xf32>
    %cst_14 = arith.constant dense<0.000000e+00> : vector<2xf32>
    %27 = vector.multi_reduction <add>, %26, %cst_14 [1] : vector<2x8xf32> to vector<2xf32>
    %28 = vector.shape_cast %27 : vector<2xf32> to vector<2x1xf32>
    %29 = tpu.reciprocal %28 {approx = true} : vector<2x1xf32> -> vector<2x1xf32>
    %30 = vector.broadcast %29 : vector<2x1xf32> to vector<2x8xf32>
    %31 = arith.mulf %26, %30 : vector<2x8xf32>
    %32 = vector.shape_cast %31 : vector<2x8xf32> to vector<2x8x1xf32>
    %33 = vector.broadcast %32 : vector<2x8x1xf32> to vector<2x8x32xf32>
    %34 = arith.mulf %33, %1 : vector<2x8x32xf32>
    %cst_15 = arith.constant dense<0.000000e+00> : vector<2x32xf32>
    %35 = vector.multi_reduction <add>, %34, %cst_15 [1] : vector<2x8x32xf32> to vector<2x32xf32>
    %c0_16 = arith.constant 0 : index
    %c0_17 = arith.constant 0 : index
    %36 = vector.load %arg5[%c0_16, %c0_17] : memref<32x32xf32, #tpu.memory_space<vmem>>, vector<32x32xf32>
    %cst_18 = arith.constant dense<0.000000e+00> : vector<2x32xf32>
    %37 = tpu.matmul %35, %36, %cst_18 {dimension_numbers = #tpu.dot_dimension_numbers<[1], [0], [0], [1], [0, 0, 1, 1], [], []>} : vector<2x32xf32>, vector<32x32xf32>, vector<2x32xf32> -> vector<2x32xf32>
    %c0_19 = arith.constant 0 : index
    %c0_20 = arith.constant 0 : index
    %38 = vector.load %arg6[%c0_19, %c0_20] : memref<1x32xf32, #tpu.memory_space<vmem>>, vector<1x32xf32>
    %39 = vector.broadcast %38 : vector<1x32xf32> to vector<2x32xf32>
    %40 = arith.addf %37, %39 : vector<2x32xf32>
    %41 = math.tanh %40 : vector<2x32xf32>
    %c0_21 = arith.constant 0 : index
    %c0_22 = arith.constant 0 : index
    %42 = vector.load %arg7[%c0_21, %c0_22] : memref<32x128xf32, #tpu.memory_space<vmem>>, vector<32x128xf32>
    %cst_23 = arith.constant dense<0.000000e+00> : vector<2x128xf32>
    %43 = tpu.matmul %41, %42, %cst_23 {dimension_numbers = #tpu.dot_dimension_numbers<[1], [0], [0], [1], [0, 0, 1, 1], [], []>} : vector<2x32xf32>, vector<32x128xf32>, vector<2x128xf32> -> vector<2x128xf32>
    %c0_24 = arith.constant 0 : index
    %c0_25 = arith.constant 0 : index
    %44 = vector.load %arg8[%c0_24, %c0_25] : memref<1x128xf32, #tpu.memory_space<vmem>>, vector<1x128xf32>
    %45 = vector.broadcast %44 : vector<1x128xf32> to vector<2x128xf32>
    %46 = arith.addf %43, %45 : vector<2x128xf32>
    %c0_26 = arith.constant 0 : index
    %c0_27 = arith.constant 0 : index
    %47 = vector.load %arg9[%c0_26, %c0_27] : memref<2x128xf32, #tpu.memory_space<vmem>>, vector<2x128xf32>
    tpu.vector_store %arg9[%c0_26, %c0_27], %46 {strides = array<i32>} : memref<2x128xf32, #tpu.memory_space<vmem>>, vector<2x128xf32>,
    return
  }
}

</mosaic_0001>

<bundles_post_ra>
// kernel: tpu_custom_call.1
= control target key start
LH: loop header
LB: loop body
LE: loop exit
PB: predicated region body
PF: predicated region fallthrough
CT: control target
= control target key end

     0   :  { %14 = vsyncpa [#allocation3], 0  ;;  %s829_s0 = inlined_call_operand.vmem [shape: s32[2,1], index: 0, kind: input, shape index: {}]   ;;  %s830_s1 = inlined_call_operand.hbm [shape: bf16[2,8,32], index: 1, kind: input, shape index: {}]   ;;  %s831_s2 = inlined_call_operand.vmem [shape: f32[2,32], index: 2, kind: input, shape index: {}]   ;;  %s832_s3 = inlined_call_operand.hbm [shape: f32[32,32], index: 3, kind: input, shape index: {}]   ;;  %s833_s4 = inlined_call_operand.vmem [shape: f32[1,32], index: 4, kind: input, shape index: {}]   ;;  %s834_s5 = inlined_call_operand.hbm [shape: f32[32,32], index: 5, kind: input, shape index: {}]   ;;  %s835_s6 = inlined_call_operand.vmem [shape: f32[1,32], index: 6, kind: input, shape index: {}]   ;;  %s836_s7 = inlined_call_operand.hbm [shape: f32[32,128], index: 7, kind: input, shape index: {}]   ;;  %s837_s8 = inlined_call_operand.vmem [shape: f32[1,128], index: 8, kind: input, shape index: {}]   ;;  %s838_s9 = inlined_call_operand.hbm [shape: f32[2,128], index: 9, kind: output, shape index: {}]  }
   0x1   :  { %15 = vsyncpa [#allocation6], 0 }
   0x2   :  { %16 = vsyncpa [#allocation9], 0 }
   0x3   :  { %17 = vsyncpa [#allocation4], 0  ;;  %s682_s30 = smov [#allocation5]  }
   0x4   :  { %s39_s10 = sshll.u32 %s682_s30, 4  ;;  %s40_s10 = int_to_ptr.vmem [resolvable:$true] %s39_s10 }
   0x5   :  { %s582_s11 = scalar_lea.vmem %s40_s10, 512  ;;  %p587_p1 = scmp.lt.s32.totalorder %s40_s10, %s40_s10 }
   0x6   :  { %p583_p0 = scmp.ne.s32.totalorder %s40_s10, %s582_s11  ;;  %p588_p2 = scmp.lt.s32.totalorder %s582_s11, %s582_s11 }
   0x8   :  { %p589_p3 = por %p588_p2, %p587_p1 }
   0xa   :  { %p590_p4 = pnand %p589_p3, %p583_p0 }
   0xc   :  { %593 = shalt.err (!%p590_p4)
}
   0xd   :  { %s683_s12 = smov 128   ;;  %s684_s13 = smov 8  }
   0xe   :  { %45 = dma.hbm_to_vmem [thread:$0]  %s832_s3, 512, %s40_s10, [#allocation6], %s683_s12, %s683_s12, %s684_s13  }
   0xf   :  { %s685_s16 = smov [#allocation2]  }
  0x10   :  { %s25_s17 = sshll.u32 %s685_s16, 4  ;;  %s26_s17 = int_to_ptr.vmem [resolvable:$true] %s25_s17 }
  0x11   :  { %s602_s18 = scalar_lea.vmem %s26_s17, 128  ;;  %p607_p6 = scmp.lt.s32.totalorder %s26_s17, %s26_s17 }
  0x12   :  { %p603_p5 = scmp.ne.s32.totalorder %s26_s17, %s602_s18  ;;  %p608_p7 = scmp.lt.s32.totalorder %s602_s18, %s602_s18 }
  0x14   :  { %p609_p8 = por %p608_p7, %p607_p6 }
  0x16   :  { %p610_p9 = pnand %p609_p8, %p603_p5 }
  0x18   :  { %613 = shalt.err (!%p610_p9)
}
  0x19   :  { %s686_s19 = smov 64   ;;  %s687_s20 = smov 4  }
  0x1a   :  { %31 = dma.hbm_to_vmem [thread:$0]  %s830_s1, 128, %s26_s17, [#allocation3], %s686_s19, %s686_s19, %s687_s20  }
  0x1b   :  { %s688_s23 = smov [#allocation7]   ;;  %s689_s25 = smov [#allocation8]  }
  0x1c   :  { %s53_s24 = sshll.u32 %s688_s23, 4  ;;  %s67_s3 = sshll.u32 %s689_s25, 4  ;;  %s54_s24 = int_to_ptr.vmem [resolvable:$true] %s53_s24  ;;  %s68_s3 = int_to_ptr.vmem [resolvable:$true] %s67_s3 }
  0x1d   :  { %s622_s26 = scalar_lea.vmem %s54_s24, 512  ;;  %p627_p11 = scmp.lt.s32.totalorder %s54_s24, %s54_s24 }
  0x1e   :  { %p623_p10 = scmp.ne.s32.totalorder %s54_s24, %s622_s26  ;;  %p628_p12 = scmp.lt.s32.totalorder %s622_s26, %s622_s26 }
  0x20   :  { %p629_p13 = por %p628_p12, %p627_p11 }
  0x22   :  { %p630_p0 = pnand %p629_p13, %p623_p10 }
  0x24   :  { %633 = shalt.err (!%p630_p0)
}
  0x25   :  { %59 = dma.hbm_to_vmem [thread:$0]  %s834_s5, 512, %s54_s24, [#allocation6], %s683_s12, %s683_s12, %s684_s13  }
  0x26   :  { %s642_s1 = scalar_lea.vmem %s68_s3, 512  ;;  %p647_p2 = scmp.lt.s32.totalorder %s68_s3, %s68_s3 }
  0x27   :  { %p643_p1 = scmp.ne.s32.totalorder %s68_s3, %s642_s1  ;;  %p648_p3 = scmp.lt.s32.totalorder %s642_s1, %s642_s1 }
  0x29   :  { %p649_p4 = por %p648_p3, %p647_p2 }
  0x2b   :  { %p650_p5 = pnand %p649_p4, %p643_p1 }
  0x2d   :  { %653 = shalt.err (!%p650_p5)
}
  0x2e   :  { %73 = dma.hbm_to_vmem [thread:$0]  %s836_s7, 512, %s68_s3, [#allocation9], %s683_s12, %s683_s12, %s684_s13  }
  0x2f   :  { %674 = dma.done.wait [#allocation3], 128  }
  0x30   :  { %675 = vsyncadd [#allocation3], 4294967168 }
  0x31   :  { %676 = dma.done.wait [#allocation6], 1024  }
  0x32   :  { %677 = vsyncadd [#allocation6], 4294966272 }
  0x33   :  { %678 = dma.done.wait [#allocation9], 512  }
  0x34   :  { %679 = vsyncadd [#allocation9], 4294966784  ;;  %v690_v0 = vmov 0.0   ;;  %vm691_vm0 = vmmov 0   ;;  %v96_v1 = vld [vmem:[#allocation5 + $0x18] sm:$0xff]  ;;  %v95_v2 = vld [vmem:[#allocation5 + $0x10] sm:$0xff]  ;;  %v187_v11 = vlaneseq }
  0x35   :  { %520 = vmatprep.subr.mxu0 %v690_v0  ;;  %528 = vmatprep.mubr.msk.f32.mxu0 %vm691_vm0, %v690_v0  ;;  %v94_v3 = vld [vmem:[#allocation5 + $0x8] sm:$0xff]  ;;  %v93_v4 = vld [vmem:[#allocation5] sm:$0xff]  ;;  %v92_v5 = vld [vmem:[%s831_s2] sm:$0x3]  ;;  %vm97_vm1 = vcmask 261120   ;;  %vm179_vm2 = vcmask 254976  }
  0x36   :  { %531 = vmatprep.subr.mxu1 %v690_v0  ;;  %539 = vmatprep.mubr.msk.f32.mxu1 %vm691_vm0, %v690_v0  ;;  %v496_v6 = vld [vmem:[%s833_s4] ss:$0 sm:$0xff]  ;;  %v692_v9 = vmov 1966171168   ;;  %v785_v13 = vshrl.u32 %v187_v11, 7  ;;  %v693_v31 = vmov 0  }
  0x37   :  { %521 = vmatpush3.msra.mxu0 %v96_v1  ;;  %v178_v7 = vmul.f32 %v496_v6, %v92_v5  ;;  %v185_v10 = vunpack.c.l.s4 %v692_v9  ;;  %v788_v16 = vld [vmem:[#allocation2] sm:$0xff]   ;;  %566 = vset.pattern.permute.xlu1 %v693_v31  ;;  %v238_v41 = vand.u32 127, %v187_v11  ;;  %vm260_vm3 = vcmask 1041409   ;;  %v308_v61 = vld [vmem:[#allocation7 + $0x10] sm:$0xff]  ;;  %v307_v63 = vld [vmem:[#allocation7 + $0x8] sm:$0xff]  ;;  %s694_s15 = smov [#allocation10]  }
  0x38   :  { %522 = vmatprep.subr.mxu0 %v690_v0  ;;  %v208_v18 = vsub.s32 0, %v785_v13  ;;  %v503_v22 = vunpack.c.l.bf16 %v788_v16  ;;  %v504_v25 = vunpack.c.h.bf16 %v788_v16  ;;  %567 = vset.pattern.permute.xlu0 %v693_v31  ;;  %v231_v33 = vsub.s32 1, %v785_v13  ;;  %v239_v40 = vld [vmem:[%s829_s0] sm:$0x3]  ;;  %v306_v1 = vld [vmem:[#allocation7] sm:$0xff]  ;;  %v395_v16 = vld [vmem:[#allocation8 + $0x10] sm:$0xff] }
  0x39   :  { %523 = vmatpush3.msra.mxu0 %v95_v2  ;;  %v180_v8 = vsel %vm179_vm2, %v178_v7, 0.0  ;;  %v186_v12 = vunpack.c.0.s8 %v185_v10  ;;  %v254_v42 = vsub.s32 %v238_v41, %v785_v13  ;;  %vm264_vm4 = vcmask 58368   ;;  %v309_v60 = vld [vmem:[#allocation7 + $0x18] sm:$0xff]  ;;  %s484_s16 = sshll.u32 %s694_s15, 4  ;;  %s485_s16 = int_to_ptr.vmem [resolvable:$true] %s484_s16 }
  0x3a   :  { %524 = vmatprep.subr.mxu0 %v690_v0  ;;  %181 = vadd.xlane.f32.xlu0 %v180_v8  ;;  %s654_s17 = scalar_lea.vmem %s485_s16, 32  ;;  %p659_p7 = scmp.lt.s32.totalorder %s485_s16, %s485_s16 }
  0x3b   :  { %525 = vmatpush3.msra.mxu0 %v94_v3  ;;  %v189_v14 = vsub.s32 %v186_v12, %v785_v13  ;;  %532 = vmatpush3.msra.mxu1 %v309_v60  ;;  %p655_p6 = scmp.ne.s32.totalorder %s485_s16, %s654_s17  ;;  %p660_p8 = scmp.lt.s32.totalorder %s654_s17, %s654_s17 }
  0x3c   :  { %526 = vmatprep.subr.mxu0 %v690_v0  ;;  %533 = vmatprep.subr.mxu1 %v690_v0 }
  0x3d   :  { %527 = vmatpush3.msra.mxu0 %v93_v4  ;;  %534 = vmatpush3.msra.mxu1 %v308_v61  ;;  %p661_p9 = por %p660_p8, %p659_p7 }
  0x3e   :  { %529 = vmatmul.mubr.msk.f32.vlgmr.msra.gmra.mxu0 %vm97_vm1, %v92_v5  ;;  %542 = vmatprep.subr.mxu0 %v690_v0 }
  0x3f   :  { %550 = vmatprep.mubr.msk.f32.mxu0 %vm691_vm0, %v690_v0  ;;  %535 = vmatprep.subr.mxu1 %v690_v0  ;;  %p662_p10 = pnand %p661_p9, %p655_p6 }
  0x40   :  { %536 = vmatpush3.msra.mxu1 %v307_v63 }
  0x41   :  { %537 = vmatprep.subr.mxu1 %v690_v0 }
  0x42   :  { %538 = vmatpush3.msra.mxu1 %v306_v1 }
  0xc3   :  { %v182_v32 = vpop.xlane.xlu0 %181 }
  0xc4   :  { %v228_v34 = vrot.slane %v182_v32, %v208_v18  ;;  %v232_v36 = vrot.slane %v182_v32, %v231_v33 }
  0xfe   :  { %v167_v15 = vpop.f32.mrf.mxu0 }
  0xff   :  { %v190_v17 = vrot.slane %v167_v15, %v189_v14 }
 0x100   :  { %v530_v19 = vpop.f32.mrf.mxu0 }
 0x101   :  { %v191_v20 = vcombine.high %v190_v17, %v190_v17  ;;  %v198_v21 = vrot.slane %v190_v17, %v189_v14 }
 0x103   :  { %v205_v23 = vrot.slane %v191_v20, %v189_v14  ;;  %v209_v24 = vrot.slane %v198_v21, %v208_v18 }
 0x105   :  { %v216_v26 = vmul.f32 %v503_v22, %v209_v24  ;;  %v213_v27 = vrot.slane %v205_v23, %v208_v18  ;;  %v394_v23 = vld [vmem:[#allocation8 + $0x8] sm:$0xff]  ;;  %v393_v24 = vld [vmem:[#allocation8] sm:$0xff] }
 0x107   :  { %v218_v28 = vsel %vm97_vm1, %v216_v26, 0.0  ;;  %v217_v29 = vmul.f32 %v504_v25, %v213_v27 }
 0x108   :  { %219 = vadd.xlane.f32.xlu0 %v218_v28 }
 0x109   :  { %v221_v30 = vsel %vm97_vm1, %v217_v29, 0.0 }
 0x10a   :  { %222 = vadd.xlane.f32.xlu1 %v221_v30  ;;  %v499_v30 = vld [vmem:[%s837_s8] ss:$0 sm:$0xff] }
 0x191   :  { %v220_v35 = vpop.xlane.xlu0 %219 }
 0x192   :  { %v235_v37 = vadd.f32 %v228_v34, %v220_v35 }
 0x193   :  { %v223_v38 = vpop.xlane.xlu1 %222 }
 0x194   :  { %v236_v39 = vadd.f32 %v232_v36, %v223_v38  ;;  %247 = vperm.xlu1 %566, %v235_v37  }
 0x196   :  { %250 = vperm.xlu0 %567, %v236_v39  }
 0x198   :  { %241 = vperm.xlu1 %566, %v239_v40  }
 0x20f   :  { %v248_v43 = vpop.permute.xlu1 %247 }
 0x210   :  { %v255_v45 = vrot.slane %v248_v43, %v254_v42 }
 0x211   :  { %v251_v44 = vpop.permute.xlu0 %250 }
 0x212   :  { %v259_v46 = vrot.slane %v251_v44, %v254_v42 }
 0x213   :  { %v242_v47 = vpop.permute.xlu1 %241 }
 0x214   :  { %vm243_vm5 = vcmp.lt.s32.totalorder %v238_v41, %v242_v47  ;;  %v261_v48 = vsel %vm260_vm3, %v259_v46, %v255_v45 }
 0x215   :  { %v263_v49 = vsel %vm243_vm5, %v261_v48, -1e+10 }
 0x216   :  { %v265_v50 = vsel %vm264_vm4, %v263_v49, -inf }
 0x217   :  { %266 = vmax.xlane.f32.xlu1 %v265_v50 }
 0x2a0   :  { %v267_v51 = vpop.xlane.xlu1 %266 }
 0x2a1   :  { %v268_v52 = vsub.f32 %v263_v49, %v267_v51 }
 0x2a3   :  { %v269_v53 = vmul.f32 1.442695, %v268_v52 }
 0x2a5   :  { %568 = vpow2.f32 %v269_v53 }
 0x2b2   :  { %v569_v54 = vpop.eup %568 }
 0x2b3   :  { %v271_v55 = vsel %vm264_vm4, %v569_v54, 0.0 }
 0x2b4   :  { %272 = vadd.xlane.f32.xlu0 %v271_v55 }
 0x33d   :  { %v273_v56 = vpop.xlane.xlu0 %272 }
 0x33e   :  { %570 = vrcp.f32 %v273_v56 }
 0x34b   :  { %v571_v57 = vpop.eup %570 }
 0x34c   :  { %v275_v58 = vmul.f32 %v571_v57, %v569_v54 }
 0x34e   :  { %v279_v59 = vrot.slane %v275_v58, %v208_v18  ;;  %v286_v62 = vrot.slane %v275_v58, %v231_v33 }
 0x350   :  { %281 = vbcast.lane.b32.xlu1 %v279_v59, 256 }
 0x354   :  { %288 = vbcast.lane.b32.xlu1 %v286_v62, 256 }
 0x3c2   :  { %v282_v2 = vpop.permute.xlu1 %281 }
 0x3c3   :  { %v290_v3 = vmul.f32 %v503_v22, %v282_v2  ;;  %v396_v22 = vld [vmem:[#allocation8 + $0x18] sm:$0xff] }
 0x3c4   :  { %543 = vmatpush3.msra.mxu0 %v396_v22 }
 0x3c5   :  { %v292_v4 = vsel %vm97_vm1, %v290_v3, 0.0  ;;  %544 = vmatprep.subr.mxu0 %v690_v0 }
 0x3c6   :  { %v293_v5 = vrot.slane %v292_v4, 4  ;;  %v289_v6 = vpop.permute.xlu1 %288  ;;  %545 = vmatpush3.msra.mxu0 %v395_v16 }
 0x3c7   :  { %v291_v7 = vmul.f32 %v504_v25, %v289_v6  ;;  %546 = vmatprep.subr.mxu0 %v690_v0  ;;  %v497_v25 = vld [vmem:[%s835_s6] ss:$0 sm:$0xff] }
 0x3c8   :  { %v294_v8 = vadd.f32 %v293_v5, %v292_v4  ;;  %547 = vmatpush3.msra.mxu0 %v394_v23 }
 0x3c9   :  { %v299_v9 = vsel %vm97_vm1, %v291_v7, 0.0  ;;  %548 = vmatprep.subr.mxu0 %v690_v0 }
 0x3ca   :  { %v295_v10 = vrot.slane %v294_v8, 2  ;;  %v300_v11 = vrot.slane %v299_v9, 4  ;;  %549 = vmatpush3.msra.mxu0 %v393_v24 }
 0x3cc   :  { %v296_v12 = vadd.f32 %v295_v10, %v294_v8  ;;  %v301_v13 = vadd.f32 %v300_v11, %v299_v9 }
 0x3ce   :  { %v302_v14 = vrot.slane %v301_v13, 2  ;;  %v297_v15 = vrot.slane %v296_v12, 1 }
 0x3d0   :  { %v303_v17 = vadd.f32 %v302_v14, %v301_v13  ;;  %v298_v19 = vadd.f32 %v297_v15, %v296_v12 }
 0x3d2   :  { %v304_v18 = vrot.slane %v303_v17, 1 }
 0x3d4   :  { %v305_v20 = vadd.f32 %v304_v18, %v303_v17 }
 0x3d6   :  { %v319_v21 = vsel %vm260_vm3, %v305_v20, %v298_v19 }
 0x3d7   :  { %540 = vmatmul.mubr.msk.f32.vlgmr.msra.gmra.mxu1 %vm97_vm1, %v319_v21 }
 0x497   :  { %v388_v26 = vpop.f32.mrf.mxu1 }
 0x498   :  { %v389_v27 = vadd.f32 %v497_v25, %v388_v26 }
 0x499   :  { %v541_v28 = vpop.f32.mrf.mxu1 }
 0x49a   :  { %572 = vtanh.f32 %v389_v27 }
 0x4a7   :  { %v573_v29 = vpop.eup %572 }
 0x4a8   :  { %551 = vmatmul.mubr.msk.f32.vlgmr.msra.gmra.mxu0 %vm97_vm1, %v573_v29 }
 0x568   :  { %v473_v31 = vpop.f32.mrf.mxu0 }
 0x569   :  { %v474_v0 = vadd.f32 %v499_v30, %v473_v31 }
 0x56a   :  { %v552_v32 = vpop.f32.mrf.mxu0 }
 0x56b   :  { %477 = vst [vmem:[#allocation10] sm:$0x3] %v474_v0 }
 0x56c   :  { %665 = shalt.err (!%p662_p10)
}
 0x56d   :  { %487 = dma.vmem_to_hbm [thread:$0]  %s485_s16, 32, %s838_s9, [#allocation4]  }
 0x56e   :  { %680 = dma.done.wait [#allocation4], 32  }
 0x56f   :  { %681 = vsyncadd [#allocation4], 4294967264 }
 0x570   :  { %491 = vsyncpa [#allocation3], 1 }
 0x571   :  { %492 = vsyncpa [#allocation6], 1 }
 0x572   :  { %493 = vsyncpa [#allocation9], 1 }
 0x573   :  { %494 = vsyncpa [#allocation4], 1 }

</bundles_post_ra>
